<compile_context>
chip_gen: v5e
topology: v5e:2x2
jax: 0.10.0
libtpu: 0.0.40
codegen_flags: <defaults>
</compile_context>

<pallas_src>
import jax
import jax.numpy as jnp
from jax.experimental import pallas as pl
from jax.experimental.pallas import tpu as pltpu


def _round_up(a: int, b: int) -> int:
    return ((a + b - 1) // b) * b


def _linear_cat_kernel(x_ref, wt_ref, x_out_ref, y_out_ref, acc_ref):
    """Produces one (tm, tn) output tile; grid axis 2 is the K (contraction) loop."""
    k = pl.program_id(2)

    # Natural MXU layout: x tile (tm, tk) @ w^T tile (tk, tn) -> (tm, tn), f32 accumulate.
    prod = jnp.dot(x_ref[...], wt_ref[...], preferred_element_type=jnp.float32)

    @pl.when(k == 0)
    def _():
        acc_ref[...] = prod          # no separate zero store + read-modify-write

    @pl.when(k != 0)
    def _():
        acc_ref[...] += prod

    @pl.when(k == pl.num_programs(2) - 1)
    def _():
        out = acc_ref[...].astype(x_out_ref.dtype)
        # Single matmul, duplicated only at store time (data already resident in VMEM):
        x_out_ref[...] = out          # the "x" return value
        y_out_ref[0] = out            # first half of cat([x, x], dim=0)
        y_out_ref[1] = out            # second half of cat([x, x], dim=0)


def multi_output_arg_mlp(x, w, *, tm=512, tn=512, tk=1024,
                         compute_dtype=jnp.bfloat16, input_buffers=2):
    """x: [M, dim]; w: [out_dim, dim] (nn.Linear weight layout, bias=False).

    Returns (x_out [M, out_dim], y_out [2*M, out_dim]) with y_out = cat([x_out, x_out], 0).
    Output dtype matches x.dtype; the matmul runs in `compute_dtype` with f32 accumulation.
    """
    M, dim = x.shape
    out_dim, dim_w = w.shape
    assert dim == dim_w, (dim, dim_w)

    out_dtype = x.dtype
    if compute_dtype is None:
        compute_dtype = x.dtype

    # One-time transpose to [dim, out_dim]. The weight is a reused (DDP) parameter, so
    # this amortizes to zero and the kernel's RHS tile is already [K, N] for the MXU.
    wt = w.T.astype(compute_dtype)
    x_c = x.astype(compute_dtype)

    in_bytes = jnp.dtype(compute_dtype).itemsize
    out_bytes = jnp.dtype(out_dtype).itemsize
    sub = max(8, 32 // in_bytes)            # dtype-aware sublane granularity: 8/16/32

    # Clamp tile sizes to the hardware-aligned problem size so tiny shapes still produce
    # legal (8,128)-aligned blocks; large shapes get real tiling.
    tm = min(tm, _round_up(M, sub))
    tn = min(tn, _round_up(out_dim, 128))   # lane-dense output tiles (multiple of 128)
    tk = min(tk, _round_up(dim, 128))

    m_p = _round_up(M, tm)
    n_p = _round_up(out_dim, tn)
    k_p = _round_up(dim, tk)

    # Guarantee >= 2 parallel output blocks when possible so both v7x TensorCores get
    # work (a single extra grid step elsewhere is near-free).
    if (m_p // tm) * (n_p // tn) < 2 and tm >= 2 * sub:
        tm = _round_up(tm // 2, sub)
        m_p = _round_up(M, tm)

    # Zero-pad once (zeros contribute nothing to the contraction).
    x_p = x_c if (m_p == M and k_p == dim) else jnp.pad(
        x_c, ((0, m_p - M), (0, k_p - dim)))
    wt_p = wt if (k_p == dim and n_p == out_dim) else jnp.pad(
        wt, ((0, k_p - dim), (0, n_p - out_dim)))

    grid = (m_p // tm, n_p // tn, k_p // tk)

    # Explicit VMEM budget: double-buffered inputs + x/y output tiles + f32 accumulator.
    # Capped at 64 MiB so the same config never overshoots v7x physical VMEM.
    vmem_est = (2 * (tm * tk + tk * tn) * in_bytes
                + 2 * (tm * tn) * out_bytes
                + 2 * (2 * tm * tn) * out_bytes
                + tm * tn * 4)
    vmem_limit = int(min(max(2 * vmem_est, 32 << 20), 64 << 20))

    in_kwargs = {}
    if input_buffers != 2:
        # Deeper input pipelining (useful on v5e if the k-loop DMA is exposed).
        in_kwargs = dict(pipeline_mode=pl.Buffered(input_buffers))

    x_out_p, y_p = pl.pallas_call(
        _linear_cat_kernel,
        out_shape=(
            jax.ShapeDtypeStruct((m_p, n_p), out_dtype),
            jax.ShapeDtypeStruct((2, m_p, n_p), out_dtype),
        ),
        grid_spec=pltpu.PrefetchScalarGridSpec(
            num_scalar_prefetch=0,
            grid=grid,
            in_specs=[
                pl.BlockSpec((tm, tk), lambda i, j, k: (i, k), **in_kwargs),  # x tiles
                pl.BlockSpec((tk, tn), lambda i, j, k: (k, j), **in_kwargs),  # w^T tiles [K, N]
            ],
            out_specs=[
                pl.BlockSpec((tm, tn), lambda i, j, k: (i, j)),        # x output tile
                pl.BlockSpec((2, tm, tn), lambda i, j, k: (0, i, j)),  # both halves of y
            ],
            scratch_shapes=[pltpu.VMEM((tm, tn), jnp.float32)],        # f32 accumulator
        ),
        compiler_params=pltpu.CompilerParams(
            dimension_semantics=("parallel", "parallel", "arbitrary"),
            vmem_limit_bytes=vmem_limit,
        ),
    )(x_p, wt_p)

    if m_p == M and n_p == out_dim:
        x_out = x_out_p
        y_out = y_p.reshape(2 * M, out_dim)   # contiguous view of the stacked copies
    else:
        # Padded fallback (extra HBM round trip for y). For production shapes pick
        # tm | M and out_dim % 128 == 0 so this branch is never taken.
        x_out = x_out_p[:M, :out_dim]
        y_out = jnp.concatenate(
            [y_p[0, :M, :out_dim], y_p[1, :M, :out_dim]], axis=0)
    return x_out, y_out


if __name__ == "__main__":
    key = jax.random.PRNGKey(0)
    kx, kw = jax.random.split(key)

    batch, dim, out_dim = 8, 32, 10
    x = jax.random.normal(kx, (batch, dim), dtype=jnp.float32)
    # Deterministic nn.Linear-style weight init (shape [out_dim, dim], bias=False).
    bound = 1.0 / (dim ** 0.5)
    w = jax.random.uniform(kw, (out_dim, dim), minval=-bound, maxval=bound,
                           dtype=jnp.float32)

    x_out, y_out = multi_output_arg_mlp(x, w)
    jax.block_until_ready((x_out, y_out))

    # Reference with the same bf16 input rounding the kernel uses (f32 accumulation).
    x_b = x.astype(jnp.bfloat16).astype(jnp.float32)
    w_b = w.astype(jnp.bfloat16).astype(jnp.float32)
    ref_x = jnp.dot(x_b, w_b.T, preferred_element_type=jnp.float32)
    ref_y = jnp.concatenate([ref_x, ref_x], axis=0)

    assert x_out.shape == (batch, out_dim)
    assert y_out.shape == (2 * batch, out_dim)
    assert x_out.dtype == x.dtype
    assert jnp.allclose(x_out, ref_x, atol=1e-4, rtol=1e-4)
    assert jnp.allclose(y_out, ref_y, atol=1e-4, rtol=1e-4)

    print("KERNEL_OK")
</pallas_src>

<mosaic_0001>
module attributes {stable_mosaic.version = 11 : i64} {
  func.func @_linear_cat_kernel(%arg0: i32, %arg1: i32, %arg2: i32, %arg3: memref<16x128xbf16, #tpu.memory_space<vmem>>, %arg4: memref<128x128xbf16, #tpu.memory_space<vmem>>, %arg5: memref<16x128xf32, #tpu.memory_space<vmem>>, %arg6: memref<2x16x128xf32, #tpu.memory_space<vmem>>, %arg7: memref<16x128xf32, #tpu.memory_space<vmem>>) attributes {dimension_semantics = [#tpu.dimension_semantics<parallel>, #tpu.dimension_semantics<parallel>, #tpu.dimension_semantics<arbitrary>], iteration_bounds = array<i64: 1, 1, 1>, scalar_prefetch = 0 : i64, scratch_operands = 1 : i64, tpu.core_type = #tpu.core_type<tc>, window_params = [{transform_indices = @transform_0, window_bounds = array<i64: 16, 128>}, {transform_indices = @transform_1, window_bounds = array<i64: 128, 128>}, {transform_indices = @transform_2, window_bounds = array<i64: 16, 128>}, {transform_indices = @transform_3, window_bounds = array<i64: 2, 16, 128>}]} {
    %c0 = arith.constant 0 : index
    %c0_0 = arith.constant 0 : index
    %0 = vector.load %arg3[%c0, %c0_0] : memref<16x128xbf16, #tpu.memory_space<vmem>>, vector<16x128xbf16>
    %c0_1 = arith.constant 0 : index
    %c0_2 = arith.constant 0 : index
    %1 = vector.load %arg4[%c0_1, %c0_2] : memref<128x128xbf16, #tpu.memory_space<vmem>>, vector<128x128xbf16>
    %cst = arith.constant dense<0.000000e+00> : vector<16x128xf32>
    %2 = tpu.matmul %0, %1, %cst {dimension_numbers = #tpu.dot_dimension_numbers<[1], [0], [0], [1], [0, 0, 1, 1], [], []>} : vector<16x128xbf16>, vector<128x128xbf16>, vector<16x128xf32> -> vector<16x128xf32>
    %c0_i32 = arith.constant 0 : i32
    %3 = arith.cmpi eq, %arg2, %c0_i32 : i32
    %4 = arith.extui %3 : i1 to i32
    %c0_i32_3 = arith.constant 0 : i32
    %5 = arith.cmpi ne, %4, %c0_i32_3 : i32
    scf.if %5 {
      %c0_8 = arith.constant 0 : index
      %c0_9 = arith.constant 0 : index
      %12 = vector.load %arg7[%c0_8, %c0_9] : memref<16x128xf32, #tpu.memory_space<vmem>>, vector<16x128xf32>
      tpu.vector_store %arg7[%c0_8, %c0_9], %2 {strides = array<i32>} : memref<16x128xf32, #tpu.memory_space<vmem>>, vector<16x128xf32>,
    } else {
    }
    %c0_i32_4 = arith.constant 0 : i32
    %6 = arith.cmpi ne, %arg2, %c0_i32_4 : i32
    %7 = arith.extui %6 : i1 to i32
    %c0_i32_5 = arith.constant 0 : i32
    %8 = arith.cmpi ne, %7, %c0_i32_5 : i32
    scf.if %8 {
      %c0_8 = arith.constant 0 : index
      %c0_9 = arith.constant 0 : index
      %12 = vector.load %arg7[%c0_8, %c0_9] : memref<16x128xf32, #tpu.memory_space<vmem>>, vector<16x128xf32>
      %13 = arith.addf %12, %2 : vector<16x128xf32>
      %c0_10 = arith.constant 0 : index
      %c0_11 = arith.constant 0 : index
      %14 = vector.load %arg7[%c0_10, %c0_11] : memref<16x128xf32, #tpu.memory_space<vmem>>, vector<16x128xf32>
      tpu.vector_store %arg7[%c0_10, %c0_11], %13 {strides = array<i32>} : memref<16x128xf32, #tpu.memory_space<vmem>>, vector<16x128xf32>,
    } else {
    }
    %c0_i32_6 = arith.constant 0 : i32
    %9 = arith.cmpi eq, %arg2, %c0_i32_6 : i32
    %10 = arith.extui %9 : i1 to i32
    %c0_i32_7 = arith.constant 0 : i32
    %11 = arith.cmpi ne, %10, %c0_i32_7 : i32
    scf.if %11 {
      %c0_8 = arith.constant 0 : index
      %c0_9 = arith.constant 0 : index
      %12 = vector.load %arg7[%c0_8, %c0_9] : memref<16x128xf32, #tpu.memory_space<vmem>>, vector<16x128xf32>
      %c0_10 = arith.constant 0 : index
      %c0_11 = arith.constant 0 : index
      %13 = vector.load %arg5[%c0_10, %c0_11] : memref<16x128xf32, #tpu.memory_space<vmem>>, vector<16x128xf32>
      tpu.vector_store %arg5[%c0_10, %c0_11], %12 {strides = array<i32>} : memref<16x128xf32, #tpu.memory_space<vmem>>, vector<16x128xf32>,
      %c0_12 = arith.constant 0 : index
      %c0_13 = arith.constant 0 : index
      %c0_14 = arith.constant 0 : index
      %14 = vector.load %arg6[%c0_12, %c0_13, %c0_14] : memref<2x16x128xf32, #tpu.memory_space<vmem>>, vector<1x16x128xf32>
      %15 = vector.shape_cast %14 : vector<1x16x128xf32> to vector<16x128xf32>
      %16 = vector.shape_cast %12 : vector<16x128xf32> to vector<1x16x128xf32>
      tpu.vector_store %arg6[%c0_12, %c0_13, %c0_14], %16 {strides = array<i32>} : memref<2x16x128xf32, #tpu.memory_space<vmem>>, vector<1x16x128xf32>,
      %c1 = arith.constant 1 : index
      %c0_15 = arith.constant 0 : index
      %c0_16 = arith.constant 0 : index
      %17 = vector.load %arg6[%c1, %c0_15, %c0_16] : memref<2x16x128xf32, #tpu.memory_space<vmem>>, vector<1x16x128xf32>
      %18 = vector.shape_cast %17 : vector<1x16x128xf32> to vector<16x128xf32>
      %19 = vector.shape_cast %12 : vector<16x128xf32> to vector<1x16x128xf32>
      tpu.vector_store %arg6[%c1, %c0_15, %c0_16], %19 {strides = array<i32>} : memref<2x16x128xf32, #tpu.memory_space<vmem>>, vector<1x16x128xf32>,
    } else {
    }
    return
  }
  func.func @transform_0(%arg0: i32, %arg1: i32, %arg2: i32) -> (i32, i32) {
    %c0_i32 = arith.constant 0 : i32
    return %arg0, %arg2 : i32, i32
  }
  func.func @transform_1(%arg0: i32, %arg1: i32, %arg2: i32) -> (i32, i32) {
    %c0_i32 = arith.constant 0 : i32
    return %arg2, %arg1 : i32, i32
  }
  func.func @transform_2(%arg0: i32, %arg1: i32, %arg2: i32) -> (i32, i32) {
    %c0_i32 = arith.constant 0 : i32
    return %arg0, %arg1 : i32, i32
  }
  func.func @transform_3(%arg0: i32, %arg1: i32, %arg2: i32) -> (i32, i32, i32) {
    %c0_i32 = arith.constant 0 : i32
    %c0_i32_0 = arith.constant 0 : i32
    return %c0_i32, %arg0, %arg1 : i32, i32, i32
  }
}

</mosaic_0001>

<bundles_post_ra>
// kernel: tpu_custom_call.1
= control target key start
LH: loop header
LB: loop body
LE: loop exit
PB: predicated region body
PF: predicated region fallthrough
CT: control target
= control target key end

     0   :  { %9 = vsyncpa [#allocation4], 0  ;;  %s396_s0 = inlined_call_operand.hbm [shape: bf16[16,128], index: 0, kind: input, shape index: {}]   ;;  %s397_s1 = inlined_call_operand.hbm [shape: bf16[128,128], index: 1, kind: input, shape index: {}]   ;;  %s398_s2 = inlined_call_operand.hbm [shape: f32[16,128], index: 2, kind: output, shape index: {0}]   ;;  %s399_s3 = inlined_call_operand.hbm [shape: f32[2,16,128], index: 3, kind: output, shape index: {1}]  }
   0x1   :  { %10 = vsyncpa [#allocation7], 0 }
   0x2   :  { %11 = vsyncpa [#allocation5], 0 }
   0x3   :  { %12 = vsyncpa [#allocation10], 0  ;;  %s17_s14 = sshll.u32 %s396_s0, 4  ;;  %s356_s15 = smov [#allocation3]   ;;  %s18_s14 = int_to_ptr.hbm [resolvable:$true] %s17_s14 }
   0x4   :  { %s19_s16 = sshll.u32 %s356_s15, 4  ;;  %s30_s19 = sshll.u32 %s397_s1, 4  ;;  %s20_s16 = int_to_ptr.vmem [resolvable:$true] %s19_s16  ;;  %s31_s19 = int_to_ptr.hbm [resolvable:$true] %s30_s19 }
   0x5   :  { %s357_s20 = smov 64   ;;  %s358_s21 = smov 4  }
   0x6   :  { %25 = dma.hbm_to_vmem [thread:$0]  %s18_s14, 128, %s20_s16, [#allocation4], %s357_s20, %s357_s20, %s358_s21  }
   0x7   :  { %s359_s22 = smov [#allocation6]  }
   0x8   :  { %s32_s23 = sshll.u32 %s359_s22, 4  ;;  %s33_s23 = int_to_ptr.vmem [resolvable:$true] %s32_s23 }
   0x9   :  { %38 = dma.hbm_to_vmem [thread:$0]  %s31_s19, 1024, %s33_s23, [#allocation7], %s357_s20, %s357_s20, %s358_s21  }
   0xa   :  { %348 = dma.done.wait [#allocation4], 128  }
   0xb   :  { %349 = vsyncadd [#allocation4], 4294967168 }
   0xc   :  { %350 = dma.done.wait [#allocation7], 1024  }
   0xd   :  { %351 = vsyncadd [#allocation7], 4294966272  ;;  %v243_v0 = vld [vmem:[#allocation6 + $0x38] sm:$0xff]  ;;  %v242_v1 = vld [vmem:[#allocation6 + $0x30] sm:$0xff]  ;;  %s360_s0 = smov [#allocation8]   ;;  %s167_s26 = sshll.u32 %s398_s2, 4  ;;  %s168_s26 = int_to_ptr.hbm [resolvable:$true] %s167_s26 }
   0xe   :  { %119 = vmatpush.bf16.msra.mxu0 %v243_v0  ;;  %v241_v2 = vld [vmem:[#allocation6 + $0x28] sm:$0xff]  ;;  %v240_v3 = vld [vmem:[#allocation6 + $0x20] sm:$0xff]  ;;  %v239_v4 = vld [vmem:[#allocation6 + $0x18] sm:$0xff]  ;;  %s165_s1 = sshll.u32 %s360_s0, 4  ;;  %s361_s27 = smov [#allocation9]   ;;  %s166_s1 = int_to_ptr.vmem [resolvable:$true] %s165_s1 }
   0xf   :  { %v238_v5 = vld [vmem:[#allocation6 + $0x10] sm:$0xff]  ;;  %v237_v6 = vld [vmem:[#allocation6 + $0x8] sm:$0xff]  ;;  %v236_v7 = vld [vmem:[#allocation6] sm:$0xff]  ;;  %s178_s28 = sshll.u32 %s361_s27, 4  ;;  %s180_s4 = sshll.u32 %s399_s3, 4  ;;  %s179_s28 = int_to_ptr.vmem [resolvable:$true] %s178_s28  ;;  %s181_s4 = int_to_ptr.hbm [resolvable:$true] %s180_s4 }
  0x10   :  { %v235_v8 = vld [vmem:[#allocation3] sm:$0xff]  ;;  %s362_s5 = smov 128   ;;  %s363_s6 = smov 8  }
  0x12   :  { %120 = vmatpush.bf16.msra.mxu0 %v242_v1 }
  0x16   :  { %121 = vmatpush.bf16.msra.mxu0 %v241_v2 }
  0x1a   :  { %122 = vmatpush.bf16.msra.mxu0 %v240_v3 }
  0x1e   :  { %123 = vmatpush.bf16.msra.mxu0 %v239_v4 }
  0x22   :  { %124 = vmatpush.bf16.msra.mxu0 %v238_v5 }
  0x26   :  { %125 = vmatpush.bf16.msra.mxu0 %v237_v6 }
  0x2a   :  { %126 = vmatpush.bf16.msra.mxu0 %v236_v7 }
  0x2d   :  { %127 = vmatmul.bf16.vlgmr.msra.gmra.mxu0 %v235_v8 }
  0xaa   :  { %v128_v9 = vpop.f32.mrf.mxu0 }
  0xab   :  { %154 = vst [vmem:[#allocation8] sm:$0xff] %v128_v9 }
  0xac   :  { %156 = vst [vmem:[#allocation9] sm:$0xff] %v128_v9 }
  0xad   :  { %159 = vst [vmem:[#allocation9 + $0x10] sm:$0xff] %v128_v9 }
  0xb2   :  { %v130_v10 = vpop.f32.mrf.mxu0 }
  0xb3   :  { %155 = vst [vmem:[#allocation8 + $0x8] sm:$0xff] %v130_v10 }
  0xb4   :  { %157 = vst [vmem:[#allocation9 + $0x8] sm:$0xff] %v130_v10  ;;  %173 = dma.vmem_to_hbm [thread:$0]  %s166_s1, 256, %s168_s26, [#allocation5], %s362_s5, %s362_s5, %s363_s6  }
  0xb5   :  { %160 = vst [vmem:[#allocation9 + $0x18] sm:$0xff] %v130_v10 }
  0xb6   :  { %186 = dma.vmem_to_hbm [thread:$0]  %s179_s28, 512, %s181_s4, [#allocation10], %s362_s5, %s362_s5, %s363_s6  }
  0xb7   :  { %352 = dma.done.wait [#allocation5], 256  }
  0xb8   :  { %353 = vsyncadd [#allocation5], 4294967040 }
  0xb9   :  { %354 = dma.done.wait [#allocation10], 512  }
  0xba   :  { %355 = vsyncadd [#allocation10], 4294966784 }
  0xbb   :  { %195 = vsyncpa [#allocation4], 1 }
  0xbc   :  { %196 = vsyncpa [#allocation7], 1 }
  0xbd   :  { %197 = vsyncpa [#allocation5], 1 }
  0xbe   :  { %198 = vsyncpa [#allocation10], 1 }

</bundles_post_ra>
